<compile_context>
chip_gen: v5e
topology: v5e:2x2
jax: 0.10.0
libtpu: 0.0.40
codegen_flags: <defaults>
</compile_context>

<pallas_src>
import math
import functools

import jax
import jax.numpy as jnp
from jax import lax
from jax.experimental import pallas as pl
from jax.experimental.pallas import tpu as pltpu


def _lowbias32(x):
    """Stateless 32-bit integer mix (lowbias32 finalizer). x: uint32 array."""
    x = x ^ (x >> 16)
    x = x * jnp.uint32(0x7FEB352D)
    x = x ^ (x >> 15)
    x = x * jnp.uint32(0x846CA68B)
    x = x ^ (x >> 16)
    return x


def _fused_dal_kernel(seed_ref, x1_ref, x2_ref, w_ref, b_ref, o_ref, *,
                      dropout_prob: float, training: bool, eps: float,
                      hidden: int, block_rows: int):
    x1 = x1_ref[...]
    x2 = x2_ref[...]

    if training and dropout_prob >= 1.0:
        # p == 1.0: everything dropped (avoids 1/(1-p) divide-by-zero).
        dropped = jnp.zeros_like(x1)
    elif training and dropout_prob > 0.0:
        # Stateless counter-based PRNG: the keep-mask depends only on
        # (seed, global element index), so it is independent of the tiling and
        # of grid iteration order -> the grid axis can safely be "parallel".
        shape = x1.shape
        row = (lax.broadcasted_iota(jnp.int32, shape, 0)
               + pl.program_id(0) * block_rows)
        col = lax.broadcasted_iota(jnp.int32, shape, 1)
        idx = (row * hidden + col).astype(jnp.uint32)
        seed_u = seed_ref[0].astype(jnp.uint32)
        bits = _lowbias32(idx * jnp.uint32(0x9E3779B1)
                          + seed_u * jnp.uint32(0x85EBCA77))
        threshold = jnp.uint32(min(int(dropout_prob * (1 << 32)), (1 << 32) - 1))
        keep = bits >= threshold
        scale = jnp.asarray(1.0 / (1.0 - dropout_prob), dtype=x1.dtype)
        dropped = jnp.where(keep, x1 * scale, jnp.zeros_like(x1))
    else:
        dropped = x1

    # Residual add in the input dtype (bf16 stays bf16 -> less vreg/VMEM
    # pressure on v6e/v7x); reductions + normalization in f32.
    y = (dropped + x2).astype(jnp.float32)
    mean = jnp.mean(y, axis=-1, keepdims=True)
    centered = y - mean
    var = jnp.mean(centered * centered, axis=-1, keepdims=True)
    inv = lax.rsqrt(var + jnp.float32(eps))

    w = w_ref[...].astype(jnp.float32)   # (1, hidden), broadcasts over rows
    b = b_ref[...].astype(jnp.float32)
    o_ref[...] = (centered * inv * w + b).astype(o_ref.dtype)


def _pick_block_rows(rows, hidden, in_dtype, out_dtype, requested=None,
                     vmem_budget_bytes=32 * 1024 * 1024):
    """Largest row tile (multiple of the sublane pack) fitting the VMEM budget."""
    in_b = jnp.dtype(in_dtype).itemsize
    out_b = jnp.dtype(out_dtype).itemsize
    sub = max(8, 32 // in_b)            # f32 -> 8, bf16 -> 16, int8/fp8 -> 32
    if requested is None:
        # 2 inputs + 1 output, double-buffered, plus ~4 f32 temporaries per row.
        bytes_per_row = hidden * (2 * (2 * in_b + out_b) + 4 * 4)
        requested = max(vmem_budget_bytes // max(bytes_per_row, 1), sub)
        requested = min(requested, 1024)
    br = max(sub, (int(requested) // sub) * sub)
    rows_to_sub = ((rows + sub - 1) // sub) * sub
    return min(br, rows_to_sub)


def fused_dropout_add_layernorm(input1, input2, weight, bias, *,
                                dropout_prob: float, training: bool,
                                eps: float, seed: int = 0,
                                block_rows=None):
    assert input1.shape == input2.shape
    orig_shape = input1.shape
    hidden = orig_shape[-1]
    rows = math.prod(orig_shape[:-1])
    out_dtype = input1.dtype

    # TODO(synk): hidden < 128 (demo uses 32) leaves most of every lane-vreg
    # unused and lowers to masked partial stores; production shapes should keep
    # hidden a multiple of 128 for full HBM-roofline throughput.

    br = _pick_block_rows(rows, hidden, input1.dtype, out_dtype, block_rows)
    rows_padded = ((rows + br - 1) // br) * br

    x1 = input1.reshape(rows, hidden)
    x2 = input2.reshape(rows, hidden)
    if rows_padded != rows:
        pad = rows_padded - rows
        x1 = jnp.pad(x1, ((0, pad), (0, 0)))
        x2 = jnp.pad(x2, ((0, pad), (0, 0)))
    w2 = weight.reshape(1, hidden)
    b2 = bias.reshape(1, hidden)
    seed_arr = jnp.asarray([seed], dtype=jnp.int32)

    grid = rows_padded // br

    kernel = functools.partial(
        _fused_dal_kernel, dropout_prob=float(dropout_prob),
        training=bool(training), eps=float(eps), hidden=hidden, block_rows=br)

    # Scoped-VMEM limit sized to the chosen tile (double-buffered streams +
    # f32 temporaries), kept <= 64 MiB so it also fits one v7x TensorCore.
    in_b = jnp.dtype(input1.dtype).itemsize
    out_b = jnp.dtype(out_dtype).itemsize
    est = br * hidden * (2 * (2 * in_b + out_b) + 4 * 4) + 2 * hidden * 4
    vmem_limit = int(min(max(2 * est, 32 * 1024 * 1024), 64 * 1024 * 1024))

    out = pl.pallas_call(
        kernel,
        out_shape=jax.ShapeDtypeStruct((rows_padded, hidden), out_dtype),
        grid_spec=pltpu.PrefetchScalarGridSpec(
            num_scalar_prefetch=1,
            grid=(grid,),
            in_specs=[
                pl.BlockSpec((br, hidden), lambda i, seed: (i, 0)),
                pl.BlockSpec((br, hidden), lambda i, seed: (i, 0)),
                pl.BlockSpec((1, hidden), lambda i, seed: (0, 0)),
                pl.BlockSpec((1, hidden), lambda i, seed: (0, 0)),
            ],
            out_specs=pl.BlockSpec((br, hidden), lambda i, seed: (i, 0)),
        ),
        compiler_params=pltpu.CompilerParams(
            # Stateless PRNG -> iteration-order independent -> shardable across
            # the two v7x TensorCores; neutral on v5e/v6e.
            dimension_semantics=("parallel",),
            vmem_limit_bytes=vmem_limit),
    )(seed_arr, x1, x2, w2, b2)

    if rows_padded != rows:
        out = out[:rows]
    return out.reshape(orig_shape)


class FusedDropoutAddLayerNorm:
    """JAX/Pallas counterpart of the PyTorch module (forward only)."""

    def __init__(self, size, dropout_prob, eps=1e-5):
        self.size = size
        self.dropout_prob = dropout_prob
        self.eps = eps
        # torch.nn.LayerNorm default init: weight = ones, bias = zeros
        self.weight = jnp.ones((size,), dtype=jnp.float32)
        self.bias = jnp.zeros((size,), dtype=jnp.float32)
        self.training = True  # nn.Module default; bound like the torch partial

    def __call__(self, input1, input2, seed=0):
        return fused_dropout_add_layernorm(
            input1, input2, self.weight, self.bias,
            dropout_prob=self.dropout_prob, training=self.training,
            eps=self.eps, seed=seed)


if __name__ == "__main__":
    key = jax.random.PRNGKey(0)
    k1, k2 = jax.random.split(key)

    batch, seq, hidden = 2, 8, 32
    x1 = jax.random.normal(k1, (batch, seq, hidden), dtype=jnp.float32)
    x2 = jax.random.normal(k2, (batch, seq, hidden), dtype=jnp.float32)

    mod = FusedDropoutAddLayerNorm(size=hidden, dropout_prob=0.1, eps=1e-5)

    # No-dropout path checked against a pure-JAX reference.
    y_nodrop = fused_dropout_add_layernorm(
        x1, x2, mod.weight, mod.bias,
        dropout_prob=0.0, training=False, eps=mod.eps)
    s = x1 + x2
    mu = jnp.mean(s, axis=-1, keepdims=True)
    var = jnp.mean((s - mu) ** 2, axis=-1, keepdims=True)
    ref = (s - mu) * lax.rsqrt(var + mod.eps) * mod.weight + mod.bias
    assert jnp.allclose(y_nodrop, ref, atol=1e-5, rtol=1e-5)

    # Training path (dropout active, deterministic stateless in-kernel PRNG).
    y = mod(x1, x2, seed=1234)
    jax.block_until_ready(y)
    assert y.shape == (batch, seq, hidden)
    assert jnp.all(jnp.isfinite(y))
    assert not jnp.allclose(y, y_nodrop)  # dropout really perturbed the output

    print("KERNEL_OK")
</pallas_src>

<mosaic_0001>
module attributes {stable_mosaic.version = 11 : i64} {
  func.func @_fused_dal_kernel(%arg0: i32, %arg1: memref<1xi32, #tpu.memory_space<smem>>, %arg2: memref<16x32xf32, #tpu.memory_space<vmem>>, %arg3: memref<16x32xf32, #tpu.memory_space<vmem>>, %arg4: memref<1x32xf32, #tpu.memory_space<vmem>>, %arg5: memref<1x32xf32, #tpu.memory_space<vmem>>, %arg6: memref<16x32xf32, #tpu.memory_space<vmem>>) attributes {dimension_semantics = [#tpu.dimension_semantics<parallel>], iteration_bounds = array<i64: 1>, scalar_prefetch = 1 : i64, scratch_operands = 0 : i64, tpu.core_type = #tpu.core_type<tc>, window_params = [{transform_indices = @transform_0, window_bounds = array<i64: 16, 32>}, {transform_indices = @transform_1, window_bounds = array<i64: 16, 32>}, {pipeline_mode = #tpu.pipeline_mode<synchronous>, transform_indices = @transform_2, window_bounds = array<i64: 1, 32>}, {pipeline_mode = #tpu.pipeline_mode<synchronous>, transform_indices = @transform_3, window_bounds = array<i64: 1, 32>}, {transform_indices = @transform_4, window_bounds = array<i64: 16, 32>}]} {
    %c0 = arith.constant 0 : index
    %c0_0 = arith.constant 0 : index
    %0 = vector.load %arg2[%c0, %c0_0] : memref<16x32xf32, #tpu.memory_space<vmem>>, vector<16x32xf32>
    %c0_1 = arith.constant 0 : index
    %c0_2 = arith.constant 0 : index
    %1 = vector.load %arg3[%c0_1, %c0_2] : memref<16x32xf32, #tpu.memory_space<vmem>>, vector<16x32xf32>
    %2 = arith.addf %0, %1 : vector<16x32xf32>
    %cst = arith.constant dense<0.000000e+00> : vector<16xf32>
    %3 = vector.multi_reduction <add>, %2, %cst [1] : vector<16x32xf32> to vector<16xf32>
    %4 = vector.shape_cast %3 : vector<16xf32> to vector<16x1xf32>
    %cst_3 = arith.constant 3.200000e+01 : f32
    %5 = vector.broadcast %cst_3 : f32 to vector<16x1xf32>
    %6 = arith.divf %4, %5 : vector<16x1xf32>
    %7 = vector.broadcast %6 : vector<16x1xf32> to vector<16x32xf32>
    %8 = arith.subf %2, %7 : vector<16x32xf32>
    %9 = arith.mulf %8, %8 : vector<16x32xf32>
    %cst_4 = arith.constant dense<0.000000e+00> : vector<16xf32>
    %10 = vector.multi_reduction <add>, %9, %cst_4 [1] : vector<16x32xf32> to vector<16xf32>
    %11 = vector.shape_cast %10 : vector<16xf32> to vector<16x1xf32>
    %cst_5 = arith.constant 3.200000e+01 : f32
    %12 = vector.broadcast %cst_5 : f32 to vector<16x1xf32>
    %13 = arith.divf %11, %12 : vector<16x1xf32>
    %cst_6 = arith.constant 9.99999974E-6 : f32
    %14 = vector.broadcast %cst_6 : f32 to vector<16x1xf32>
    %15 = arith.addf %13, %14 : vector<16x1xf32>
    %16 = math.rsqrt %15 : vector<16x1xf32>
    %c0_7 = arith.constant 0 : index
    %c0_8 = arith.constant 0 : index
    %17 = vector.load %arg4[%c0_7, %c0_8] : memref<1x32xf32, #tpu.memory_space<vmem>>, vector<1x32xf32>
    %c0_9 = arith.constant 0 : index
    %c0_10 = arith.constant 0 : index
    %18 = vector.load %arg5[%c0_9, %c0_10] : memref<1x32xf32, #tpu.memory_space<vmem>>, vector<1x32xf32>
    %19 = vector.broadcast %16 : vector<16x1xf32> to vector<16x32xf32>
    %20 = arith.mulf %8, %19 : vector<16x32xf32>
    %21 = vector.broadcast %17 : vector<1x32xf32> to vector<16x32xf32>
    %22 = arith.mulf %20, %21 : vector<16x32xf32>
    %23 = vector.broadcast %18 : vector<1x32xf32> to vector<16x32xf32>
    %24 = arith.addf %22, %23 : vector<16x32xf32>
    %c0_11 = arith.constant 0 : index
    %c0_12 = arith.constant 0 : index
    %25 = vector.load %arg6[%c0_11, %c0_12] : memref<16x32xf32, #tpu.memory_space<vmem>>, vector<16x32xf32>
    tpu.vector_store %arg6[%c0_11, %c0_12], %24 {strides = array<i32>} : memref<16x32xf32, #tpu.memory_space<vmem>>, vector<16x32xf32>,
    return
  }
  func.func @transform_0(%arg0: i32, %arg1: memref<1xi32, #tpu.memory_space<smem>>) -> (i32, i32) {
    %c0_i32 = arith.constant 0 : i32
    %c0_i32_0 = arith.constant 0 : i32
    return %arg0, %c0_i32 : i32, i32
  }
  func.func @transform_1(%arg0: i32, %arg1: memref<1xi32, #tpu.memory_space<smem>>) -> (i32, i32) {
    %c0_i32 = arith.constant 0 : i32
    %c0_i32_0 = arith.constant 0 : i32
    return %arg0, %c0_i32 : i32, i32
  }
  func.func @transform_2(%arg0: i32, %arg1: memref<1xi32, #tpu.memory_space<smem>>) -> (i32, i32) {
    %c0_i32 = arith.constant 0 : i32
    %c0_i32_0 = arith.constant 0 : i32
    %c0_i32_1 = arith.constant 0 : i32
    return %c0_i32, %c0_i32_0 : i32, i32
  }
  func.func @transform_3(%arg0: i32, %arg1: memref<1xi32, #tpu.memory_space<smem>>) -> (i32, i32) {
    %c0_i32 = arith.constant 0 : i32
    %c0_i32_0 = arith.constant 0 : i32
    %c0_i32_1 = arith.constant 0 : i32
    return %c0_i32, %c0_i32_0 : i32, i32
  }
  func.func @transform_4(%arg0: i32, %arg1: memref<1xi32, #tpu.memory_space<smem>>) -> (i32, i32) {
    %c0_i32 = arith.constant 0 : i32
    %c0_i32_0 = arith.constant 0 : i32
    return %arg0, %c0_i32 : i32, i32
  }
}

</mosaic_0001>

<bundles_post_ra>
// kernel: tpu_custom_call.1
= control target key start
LH: loop header
LB: loop body
LE: loop exit
PB: predicated region body
PF: predicated region fallthrough
CT: control target
= control target key end

     0   :  { %11 = vsyncpa [#allocation5], 0  ;;  %s302_s0 = inlined_call_operand.<no memory space> [shape: s32[1], index: 0, kind: input, shape index: {}]   ;;  %s303_s1 = inlined_call_operand.hbm [shape: f32[16,32], index: 1, kind: input, shape index: {}]   ;;  %s304_s2 = inlined_call_operand.hbm [shape: f32[16,32], index: 2, kind: input, shape index: {}]   ;;  %s305_s3 = inlined_call_operand.vmem [shape: f32[1,32], index: 3, kind: input, shape index: {}]   ;;  %s306_s4 = inlined_call_operand.vmem [shape: f32[1,32], index: 4, kind: input, shape index: {}]   ;;  %s307_s5 = inlined_call_operand.hbm [shape: f32[16,32], index: 5, kind: output, shape index: {}]  }
   0x1   :  { %12 = vsyncpa [#allocation8], 0 }
   0x2   :  { %13 = vsyncpa [#allocation6], 0  ;;  %s18_s19 = sshll.u32 %s303_s1, 4  ;;  %s236_s20 = smov [#allocation4]   ;;  %s19_s19 = int_to_ptr.hbm [resolvable:$true] %s18_s19 }
   0x3   :  { %s20_s21 = sshll.u32 %s236_s20, 4  ;;  %s31_s24 = sshll.u32 %s304_s2, 4  ;;  %s21_s21 = int_to_ptr.vmem [resolvable:$true] %s20_s21  ;;  %s32_s24 = int_to_ptr.hbm [resolvable:$true] %s31_s24 }
   0x4   :  { %s237_s25 = smov 128   ;;  %s238_s26 = smov 8  }
   0x5   :  { %26 = dma.hbm_to_vmem [thread:$0]  %s19_s19, 256, %s21_s21, [#allocation5], %s237_s25, %s237_s25, %s238_s26  }
   0x6   :  { %s239_s27 = smov [#allocation7]  }
   0x7   :  { %s33_s28 = sshll.u32 %s239_s27, 4  ;;  %s34_s28 = int_to_ptr.vmem [resolvable:$true] %s33_s28 }
   0x8   :  { %39 = dma.hbm_to_vmem [thread:$0]  %s32_s24, 256, %s34_s28, [#allocation8], %s237_s25, %s237_s25, %s238_s26  }
   0x9   :  { %230 = dma.done.wait [#allocation5], 256  }
   0xa   :  { %231 = vsyncadd [#allocation5], 4294967040 }
   0xb   :  { %232 = dma.done.wait [#allocation8], 256  }
   0xc   :  { %233 = vsyncadd [#allocation8], 4294967040  ;;  %v52_v0 = vld [vmem:[#allocation4] sm:$0xff]  ;;  %v54_v1 = vld [vmem:[#allocation7] sm:$0xff]  ;;  %vm58_vm0 = vcmask 261120   ;;  %v240_v8 = vmov 32.0  }
   0xd   :  { %v56_v2 = vadd.f32 %v54_v1, %v52_v0  ;;  %v53_v3 = vld [vmem:[#allocation4 + $0x8] sm:$0xff]  ;;  %v55_v4 = vld [vmem:[#allocation7 + $0x8] sm:$0xff]  ;;  %152 = vrcp.f32 %v240_v8  ;;  %v150_v39 = vld [vmem:[%s305_s3] ss:$0 sm:$0xff]  ;;  %s241_s3 = smov [#allocation9]   ;;  %s130_s9 = sshll.u32 %s307_s5, 4  ;;  %s131_s9 = int_to_ptr.hbm [resolvable:$true] %s130_s9 }
   0xe   :  { %v57_v6 = vadd.f32 %v55_v4, %v53_v3  ;;  %v151_v43 = vld [vmem:[%s306_s4] ss:$0 sm:$0xff]  ;;  %s128_s6 = sshll.u32 %s241_s3, 4  ;;  %s129_s6 = int_to_ptr.vmem [resolvable:$true] %s128_s6 }
   0xf   :  { %v59_v5 = vsel %vm58_vm0, %v56_v2, 0.0 }
  0x10   :  { %60 = vadd.xlane.f32.xlu0 %v59_v5  ;;  %v62_v7 = vsel %vm58_vm0, %v57_v6, 0.0 }
  0x13   :  { %v153_v9 = vpop.eup %152 }
  0x14   :  { %v66_v10 = vmul.f32 32.0, %v153_v9  ;;  %vm70_vm1 = vweird.f32 %v153_v9 }
  0x16   :  { %v67_v11 = vsub.f32 1.0, %v66_v10 }
  0x18   :  { %63 = vadd.xlane.f32.xlu0 %v62_v7  ;;  %v68_v12 = vmul.f32 %v153_v9, %v67_v11 }
  0x1a   :  { %v69_v13 = vadd.f32 %v153_v9, %v68_v12 }
  0x1c   :  { %v71_v14 = vsel %vm70_vm1, %v153_v9, %v69_v13 }
  0x83   :  { %v61_v15 = vpop.xlane.xlu0 %60 }
  0x84   :  { %v72_v16 = vmul.f32 %v71_v14, %v61_v15 }
  0x86   :  { %v74_v17 = vsub.f32 %v56_v2, %v72_v16 }
  0x88   :  { %v76_v18 = vmul.f32 %v74_v17, %v74_v17 }
  0x8a   :  { %v78_v19 = vsel %vm58_vm0, %v76_v18, 0.0 }
  0x8b   :  { %79 = vadd.xlane.f32.xlu1 %v78_v19  ;;  %v64_v20 = vpop.xlane.xlu0 %63 }
  0x8c   :  { %v73_v21 = vmul.f32 %v71_v14, %v64_v20 }
  0x8e   :  { %v75_v22 = vsub.f32 %v57_v6, %v73_v21 }
  0x90   :  { %v77_v23 = vmul.f32 %v75_v22, %v75_v22 }
  0x92   :  { %v81_v24 = vsel %vm58_vm0, %v77_v23, 0.0 }
  0x93   :  { %82 = vadd.xlane.f32.xlu1 %v81_v24 }
  0xfe   :  { %v80_v25 = vpop.xlane.xlu1 %79 }
  0xff   :  { %v84_v26 = vmul.f32 %v80_v25, %v71_v14 }
 0x101   :  { %v86_v27 = vadd.f32 1e-05, %v84_v26 }
 0x103   :  { %154 = vrsqrt.f32 %v86_v27  ;;  %vm94_vm3 = vweird.f32 %v86_v27 }
 0x106   :  { %v83_v28 = vpop.xlane.xlu1 %82 }
 0x107   :  { %v85_v29 = vmul.f32 %v83_v28, %v71_v14 }
 0x109   :  { %v155_v30 = vpop.eup %154  ;;  %v87_v31 = vadd.f32 1e-05, %v85_v29 }
 0x10a   :  { %v89_v32 = vmul.f32 %v155_v30, %v86_v27  ;;  %vm95_vm2 = vweird.f32 %v155_v30 }
 0x10b   :  { %156 = vrsqrt.f32 %v87_v31  ;;  %vm96_vm4 = vmor %vm94_vm3, %vm95_vm2  ;;  %vm104_vm6 = vweird.f32 %v87_v31 }
 0x10c   :  { %v90_v33 = vmul.f32 %v155_v30, %v89_v32 }
 0x10e   :  { %v91_v34 = vmul.f32 0.5, %v90_v33 }
 0x110   :  { %v92_v35 = vsub.f32 1.5, %v91_v34 }
 0x111   :  { %v157_v36 = vpop.eup %156 }
 0x112   :  { %v93_v37 = vmul.f32 %v155_v30, %v92_v35  ;;  %v99_v38 = vmul.f32 %v157_v36, %v87_v31  ;;  %vm105_vm5 = vweird.f32 %v157_v36 }
 0x113   :  { %vm106_vm7 = vmor %vm104_vm6, %vm105_vm5 }
 0x114   :  { %v97_v40 = vsel %vm96_vm4, %v155_v30, %v93_v37  ;;  %v100_v41 = vmul.f32 %v157_v36, %v99_v38 }
 0x115   :  { %v110_v42 = vmul.f32 %v97_v40, %v74_v17 }
 0x116   :  { %v101_v44 = vmul.f32 0.5, %v100_v41 }
 0x117   :  { %v115_v45 = vmul.f32 %v150_v39, %v110_v42 }
 0x118   :  { %v102_v46 = vsub.f32 1.5, %v101_v44 }
 0x119   :  { %v120_v47 = vadd.f32 %v151_v43, %v115_v45 }
 0x11a   :  { %v103_v48 = vmul.f32 %v157_v36, %v102_v46 }
 0x11b   :  { %122 = vst.msk [vmem:[#allocation9] sm:$0xff] %vm58_vm0, %v120_v47 }
 0x11c   :  { %v107_v49 = vsel %vm106_vm7, %v157_v36, %v103_v48 }
 0x11d   :  { %v111_v50 = vmul.f32 %v107_v49, %v75_v22 }
 0x11f   :  { %v116_v51 = vmul.f32 %v150_v39, %v111_v50 }
 0x121   :  { %v121_v52 = vadd.f32 %v151_v43, %v116_v51 }
 0x123   :  { %123 = vst.msk [vmem:[#allocation9 + $0x8] sm:$0xff] %vm58_vm0, %v121_v52 }
 0x124   :  { %136 = dma.vmem_to_hbm [thread:$0]  %s129_s6, 256, %s131_s9, [#allocation6], %s237_s25, %s237_s25, %s238_s26  }
 0x125   :  { %234 = dma.done.wait [#allocation6], 256  }
 0x126   :  { %235 = vsyncadd [#allocation6], 4294967040 }
 0x127   :  { %141 = vsyncpa [#allocation5], 1 }
 0x128   :  { %142 = vsyncpa [#allocation8], 1 }
 0x129   :  { %143 = vsyncpa [#allocation6], 1 }

</bundles_post_ra>
